<compile_context>
chip_gen: v5e
topology: v5e:2x2
jax: 0.10.0
libtpu: 0.0.40
codegen_flags: <defaults>
</compile_context>

<pallas_src>
import functools
import math

import jax
import jax.numpy as jnp
from jax.experimental import pallas as pl
from jax.experimental.pallas import tpu as pltpu


# ------------------------------- Pallas kernel --------------------------------

def lstm_fused_kernel(tok_ref, fused_ih_ref, gate_bias_ref, w_hh_ref,
                      w_out_ref, b_out_ref, out_ref, *, B, S, H):
    """Fused (multi-hot @ fused-table) input projection + LSTM + linear head.

    tok_ref       : (S*B, F) int32, token ids already offset into the fused-table rows
                    (rows are time-major: timestep t owns rows [t*B, (t+1)*B)).
    fused_ih_ref  : (Kp, 4H) f32, concat_f(E_f @ W_ih), zero padded to Kp=128 rows.
    gate_bias_ref : (1, 4H) f32, b_ih + b_hh.
    w_hh_ref      : (H, 4H) f32.
    w_out_ref     : (H, Vp) f32, vocab padded to a multiple of 128 lanes.
    b_out_ref     : (1, Vp) f32.
    out_ref       : (S*B, Vp) f32.
    """
    N = S * B
    F = tok_ref.shape[1]
    Kp = fused_ih_ref.shape[0]

    tok = tok_ref[...]                                        # (N, F) int32

    # --- single multi-hot over the fused (all-features) row space ------------------
    lane = jax.lax.broadcasted_iota(jnp.int32, (N, Kp), 1)
    multihot = (lane == tok[:, 0:1]).astype(jnp.float32)
    for f in range(1, F):
        multihot = multihot + (lane == tok[:, f:f + 1]).astype(jnp.float32)

    # --- input projection for ALL timesteps in one K=128-aligned matmul ------------
    xg = jnp.dot(multihot, fused_ih_ref[...],
                 preferred_element_type=jnp.float32) + gate_bias_ref[...]   # (N, 4H)

    # --- sequential recurrence (serial by nature; S is small & static -> unrolled) --
    w_hh = w_hh_ref[...]                                      # (H, 4H)

    # Hoisted constant: 0.5 pre-scale for sigmoid gates (i, f, o), 1.0 for tanh gate.
    col = jax.lax.broadcasted_iota(jnp.int32, (B, 4 * H), 1)
    pre_scale = jnp.where((col >= 2 * H) & (col < 3 * H),
                          jnp.float32(1.0), jnp.float32(0.5))

    h = jnp.zeros((B, H), jnp.float32)
    c = jnp.zeros((B, H), jnp.float32)
    hs = []
    for t in range(S):
        g = xg[t * B:(t + 1) * B, :] + jnp.dot(
            h, w_hh, preferred_element_type=jnp.float32)      # (B, 4H)
        # One full-width tanh pass gives every gate:
        #   sigmoid(x) = 0.5 * (tanh(0.5 * x) + 1)
        tg = jnp.tanh(g * pre_scale)                          # (B, 4H)
        sg = 0.5 * (tg + 1.0)
        i_g = sg[:, 0 * H:1 * H]                              # PyTorch gate order i,f,g,o
        f_g = sg[:, 1 * H:2 * H]
        g_g = tg[:, 2 * H:3 * H]
        o_g = sg[:, 3 * H:4 * H]
        c = f_g * c + i_g * g_g
        h = o_g * jnp.tanh(c)
        hs.append(h)                                          # stays in vregs

    # --- output head over all timesteps in one matmul; padded-V => lane-dense store -
    hs_all = jnp.concatenate(hs, axis=0)                      # (N, H)
    out_ref[...] = jnp.dot(hs_all, w_out_ref[...],
                           preferred_element_type=jnp.float32) + b_out_ref[...]


# -------------------------- one-time parameter preparation ----------------------

def _round_up(x, m):
    return ((x + m - 1) // m) * m


def prepare_fused_params(params):
    """Hoisted out of the forward path: fuse embedding tables with W_ih, fold biases,
    and pad the output head to a lane-dense width.  Done once, outside jit."""
    hp = jax.lax.Precision.HIGHEST
    w_ih_t = params["w_ih_t"]                                 # (H, 4H)

    fused_blocks = [jnp.dot(tbl, w_ih_t, precision=hp) for tbl in params["emb_tables"]]
    fused = jnp.concatenate(fused_blocks, axis=0)             # (sum vocab_f, 4H)
    K = fused.shape[0]
    Kp = _round_up(K, 128)
    fused = jnp.pad(fused, ((0, Kp - K), (0, 0)))

    offsets, acc = [], 0
    for tbl in params["emb_tables"]:
        offsets.append(acc)
        acc += tbl.shape[0]

    V = params["w_out"].shape[1]
    Vp = _round_up(V, 128)

    return {
        "fused_ih": fused,                                    # (Kp, 4H)
        "gate_bias": params["b_ih"] + params["b_hh"],         # (1, 4H)
        "w_hh_t": params["w_hh_t"],                           # (H, 4H)
        "w_out_p": jnp.pad(params["w_out"], ((0, 0), (0, Vp - V))),   # (H, Vp)
        "b_out_p": jnp.pad(params["b_out"], ((0, 0), (0, Vp - V))),   # (1, Vp)
        "id_offsets": jnp.array(offsets, jnp.int32),          # (F,)
    }


# -------------------------------- host wrapper ---------------------------------

def lstm_sequence_model_forward(tokens, fused, *, vocab_out):
    """tokens: (B, S, F) int32 -> logits (B, S, vocab_out) float32."""
    B, S, F = tokens.shape
    H = fused["w_hh_t"].shape[0]
    Vp = fused["w_out_p"].shape[1]

    # time-major flatten: row t*B + b  <->  (batch b, timestep t); add per-feature
    # row offsets so each id indexes its block of the fused table.
    tok_tb = (jnp.transpose(tokens, (1, 0, 2)).reshape(S * B, F).astype(jnp.int32)
              + fused["id_offsets"][None, :])

    kernel = functools.partial(lstm_fused_kernel, B=B, S=S, H=H)
    out = pl.pallas_call(
        kernel,
        out_shape=jax.ShapeDtypeStruct((S * B, Vp), jnp.float32),
        # Single grid step: tokens, fused tables, weights and activations all live in
        # VMEM for the whole call (total resident data ~100 KB << VMEM everywhere).
        in_specs=[pl.BlockSpec(memory_space=pltpu.MemorySpace.VMEM)] * 6,
        out_specs=pl.BlockSpec(memory_space=pltpu.MemorySpace.VMEM),
    )(tok_tb, fused["fused_ih"], fused["gate_bias"], fused["w_hh_t"],
      fused["w_out_p"], fused["b_out_p"])

    # (S*B, Vp) -> (B, S, V)
    return out.reshape(S, B, Vp).transpose(1, 0, 2)[:, :, :vocab_out]


# ----------------------------- parameters & reference ---------------------------

def init_params(key, hidden_dim, feature2vocab):
    feats = list(feature2vocab.keys())
    H = hidden_dim
    V = feature2vocab["mcc"]
    n_feat = len(feats)
    keys = jax.random.split(key, n_feat + 6)
    bound = 1.0 / math.sqrt(H)

    def unif(kk, shape):
        return jax.random.uniform(kk, shape, jnp.float32, minval=-bound, maxval=bound)

    return {
        # nn.Embedding default init ~ N(0, 1)
        "emb_tables": [jax.random.normal(keys[i], (feature2vocab[f], H), jnp.float32)
                       for i, f in enumerate(feats)],
        # PyTorch stores weight_ih/hh as (4H, H); we keep the transposed (H, 4H)
        # layout so every projection is y = x @ W.  Gate order: i, f, g, o.
        "w_ih_t": unif(keys[n_feat + 0], (H, 4 * H)),
        "b_ih":   unif(keys[n_feat + 1], (1, 4 * H)),
        "w_hh_t": unif(keys[n_feat + 2], (H, 4 * H)),
        "b_hh":   unif(keys[n_feat + 3], (1, 4 * H)),
        "w_out":  unif(keys[n_feat + 4], (H, V)),
        "b_out":  unif(keys[n_feat + 5], (1, V)),
    }


def lstm_reference_forward(tokens, params):
    """Pure-JAX reference (same math as the PyTorch module), for correctness check."""
    hp = jax.lax.Precision.HIGHEST
    emb = None
    for f, table in enumerate(params["emb_tables"]):
        e = jnp.take(table, tokens[..., f], axis=0)           # (B, S, H)
        emb = e if emb is None else emb + e
    B, S, H = emb.shape
    w_ih_t, w_hh_t = params["w_ih_t"], params["w_hh_t"]
    bias = params["b_ih"][0] + params["b_hh"][0]

    def step(carry, x_t):
        h, c = carry
        g = (jnp.dot(x_t, w_ih_t, precision=hp)
             + jnp.dot(h, w_hh_t, precision=hp) + bias)
        i = jax.nn.sigmoid(g[:, 0 * H:1 * H])
        f = jax.nn.sigmoid(g[:, 1 * H:2 * H])
        gg = jnp.tanh(g[:, 2 * H:3 * H])
        o = jax.nn.sigmoid(g[:, 3 * H:4 * H])
        c = f * c + i * gg
        h = o * jnp.tanh(c)
        return (h, c), h

    xs = jnp.transpose(emb, (1, 0, 2))                        # (S, B, H)
    init = (jnp.zeros((B, H), jnp.float32), jnp.zeros((B, H), jnp.float32))
    _, hs = jax.lax.scan(step, init, xs)                      # (S, B, H)
    out = jnp.einsum("sbh,hv->sbv", hs, params["w_out"], precision=hp) + params["b_out"][0]
    return jnp.transpose(out, (1, 0, 2))                      # (B, S, V)


# ------------------------------------- main -------------------------------------

if __name__ == "__main__":
    key = jax.random.PRNGKey(0)
    hidden_dim = 32
    feature2vocab = {"mcc": 50, "amount_bin": 20, "hour": 24}
    B, S = 2, 8

    k_param, k_tok = jax.random.split(key)
    params = init_params(k_param, hidden_dim, feature2vocab)
    fused = prepare_fused_params(params)        # one-time prep, hoisted out of forward

    tok_keys = jax.random.split(k_tok, len(feature2vocab))
    cols = [jax.random.randint(tok_keys[i], (B, S), 0, v, dtype=jnp.int32)
            for i, v in enumerate(feature2vocab.values())]
    tokens = jnp.stack(cols, axis=-1)                         # (B, S, n_feat)

    fwd = jax.jit(functools.partial(lstm_sequence_model_forward,
                                    vocab_out=feature2vocab["mcc"]))
    logits = fwd(tokens, fused)
    jax.block_until_ready(logits)

    assert logits.shape == (B, S, feature2vocab["mcc"])
    assert bool(jnp.all(jnp.isfinite(logits)))

    ref = lstm_reference_forward(tokens, params)
    assert bool(jnp.allclose(logits, ref, rtol=1e-3, atol=1e-3)), \
        "Pallas LSTM kernel does not match pure-JAX reference"

    print("KERNEL_OK")
</pallas_src>

<mosaic_0001>
module attributes {stable_mosaic.version = 11 : i64} {
  func.func @lstm_fused_kernel(%arg0: memref<16x3xi32, #tpu.memory_space<vmem>>, %arg1: memref<128x128xf32, #tpu.memory_space<vmem>>, %arg2: memref<1x128xf32, #tpu.memory_space<vmem>>, %arg3: memref<32x128xf32, #tpu.memory_space<vmem>>, %arg4: memref<32x128xf32, #tpu.memory_space<vmem>>, %arg5: memref<1x128xf32, #tpu.memory_space<vmem>>, %arg6: memref<16x128xf32, #tpu.memory_space<vmem>>) attributes {dimension_semantics = [], scalar_prefetch = 0 : i64, scratch_operands = 0 : i64, tpu.core_type = #tpu.core_type<tc>} {
    %c0 = arith.constant 0 : index
    %c0_0 = arith.constant 0 : index
    %0 = vector.load %arg0[%c0, %c0_0] : memref<16x3xi32, #tpu.memory_space<vmem>>, vector<16x3xi32>
    %1 = tpu.iota {dimensions = array<i32: 1>} : vector<16x128xi32>
    %2 = vector.extract_strided_slice %0 {offsets = [0, 0], sizes = [16, 1], strides = [1, 1]} : vector<16x3xi32> to vector<16x1xi32>
    %3 = vector.broadcast %2 : vector<16x1xi32> to vector<16x128xi32>
    %4 = arith.cmpi eq, %1, %3 : vector<16x128xi32>
    %5 = arith.extui %4 : vector<16x128xi1> to vector<16x128xi32>
    %6 = arith.sitofp %5 : vector<16x128xi32> to vector<16x128xf32>
    %7 = vector.extract_strided_slice %0 {offsets = [0, 1], sizes = [16, 1], strides = [1, 1]} : vector<16x3xi32> to vector<16x1xi32>
    %8 = vector.broadcast %7 : vector<16x1xi32> to vector<16x128xi32>
    %9 = arith.cmpi eq, %1, %8 : vector<16x128xi32>
    %10 = arith.extui %9 : vector<16x128xi1> to vector<16x128xi32>
    %11 = arith.sitofp %10 : vector<16x128xi32> to vector<16x128xf32>
    %12 = arith.addf %6, %11 : vector<16x128xf32>
    %13 = vector.extract_strided_slice %0 {offsets = [0, 2], sizes = [16, 1], strides = [1, 1]} : vector<16x3xi32> to vector<16x1xi32>
    %14 = vector.broadcast %13 : vector<16x1xi32> to vector<16x128xi32>
    %15 = arith.cmpi eq, %1, %14 : vector<16x128xi32>
    %16 = arith.extui %15 : vector<16x128xi1> to vector<16x128xi32>
    %17 = arith.sitofp %16 : vector<16x128xi32> to vector<16x128xf32>
    %18 = arith.addf %12, %17 : vector<16x128xf32>
    %c0_1 = arith.constant 0 : index
    %c0_2 = arith.constant 0 : index
    %19 = vector.load %arg1[%c0_1, %c0_2] : memref<128x128xf32, #tpu.memory_space<vmem>>, vector<128x128xf32>
    %cst = arith.constant dense<0.000000e+00> : vector<16x128xf32>
    %20 = tpu.matmul %18, %19, %cst {dimension_numbers = #tpu.dot_dimension_numbers<[1], [0], [0], [1], [0, 0, 1, 1], [], []>} : vector<16x128xf32>, vector<128x128xf32>, vector<16x128xf32> -> vector<16x128xf32>
    %c0_3 = arith.constant 0 : index
    %c0_4 = arith.constant 0 : index
    %21 = vector.load %arg2[%c0_3, %c0_4] : memref<1x128xf32, #tpu.memory_space<vmem>>, vector<1x128xf32>
    %22 = vector.broadcast %21 : vector<1x128xf32> to vector<16x128xf32>
    %23 = arith.addf %20, %22 : vector<16x128xf32>
    %c0_5 = arith.constant 0 : index
    %c0_6 = arith.constant 0 : index
    %24 = vector.load %arg3[%c0_5, %c0_6] : memref<32x128xf32, #tpu.memory_space<vmem>>, vector<32x128xf32>
    %25 = tpu.iota {dimensions = array<i32: 1>} : vector<2x128xi32>
    %c64_i32 = arith.constant 64 : i32
    %26 = vector.broadcast %c64_i32 : i32 to vector<2x128xi32>
    %27 = arith.cmpi sge, %25, %26 : vector<2x128xi32>
    %c96_i32 = arith.constant 96 : i32
    %28 = vector.broadcast %c96_i32 : i32 to vector<2x128xi32>
    %29 = arith.cmpi slt, %25, %28 : vector<2x128xi32>
    %30 = arith.andi %27, %29 : vector<2x128xi1>
    %cst_7 = arith.constant 1.000000e+00 : f32
    %cst_8 = arith.constant 5.000000e-01 : f32
    %31 = vector.broadcast %cst_7 : f32 to vector<2x128xf32>
    %32 = vector.broadcast %cst_8 : f32 to vector<2x128xf32>
    %33 = arith.select %30, %31, %32 : vector<2x128xi1>, vector<2x128xf32>
    %cst_9 = arith.constant 0.000000e+00 : f32
    %34 = vector.broadcast %cst_9 : f32 to vector<2x32xf32>
    %cst_10 = arith.constant 0.000000e+00 : f32
    %35 = vector.broadcast %cst_10 : f32 to vector<2x32xf32>
    %36 = vector.extract_strided_slice %23 {offsets = [0, 0], sizes = [2, 128], strides = [1, 1]} : vector<16x128xf32> to vector<2x128xf32>
    %cst_11 = arith.constant dense<0.000000e+00> : vector<2x128xf32>
    %37 = tpu.matmul %34, %24, %cst_11 {dimension_numbers = #tpu.dot_dimension_numbers<[1], [0], [0], [1], [0, 0, 1, 1], [], []>} : vector<2x32xf32>, vector<32x128xf32>, vector<2x128xf32> -> vector<2x128xf32>
    %38 = arith.addf %36, %37 : vector<2x128xf32>
    %39 = arith.mulf %38, %33 : vector<2x128xf32>
    %40 = math.tanh %39 : vector<2x128xf32>
    %cst_12 = arith.constant 1.000000e+00 : f32
    %41 = vector.broadcast %cst_12 : f32 to vector<2x128xf32>
    %42 = arith.addf %40, %41 : vector<2x128xf32>
    %cst_13 = arith.constant 5.000000e-01 : f32
    %43 = vector.broadcast %cst_13 : f32 to vector<2x128xf32>
    %44 = arith.mulf %43, %42 : vector<2x128xf32>
    %45 = vector.extract_strided_slice %44 {offsets = [0, 0], sizes = [2, 32], strides = [1, 1]} : vector<2x128xf32> to vector<2x32xf32>
    %46 = vector.extract_strided_slice %44 {offsets = [0, 32], sizes = [2, 32], strides = [1, 1]} : vector<2x128xf32> to vector<2x32xf32>
    %47 = vector.extract_strided_slice %40 {offsets = [0, 64], sizes = [2, 32], strides = [1, 1]} : vector<2x128xf32> to vector<2x32xf32>
    %48 = vector.extract_strided_slice %44 {offsets = [0, 96], sizes = [2, 32], strides = [1, 1]} : vector<2x128xf32> to vector<2x32xf32>
    %49 = arith.mulf %46, %35 : vector<2x32xf32>
    %50 = arith.mulf %45, %47 : vector<2x32xf32>
    %51 = arith.addf %49, %50 : vector<2x32xf32>
    %52 = math.tanh %51 : vector<2x32xf32>
    %53 = arith.mulf %48, %52 : vector<2x32xf32>
    %54 = vector.extract_strided_slice %23 {offsets = [2, 0], sizes = [2, 128], strides = [1, 1]} : vector<16x128xf32> to vector<2x128xf32>
    %cst_14 = arith.constant dense<0.000000e+00> : vector<2x128xf32>
    %55 = tpu.matmul %53, %24, %cst_14 {dimension_numbers = #tpu.dot_dimension_numbers<[1], [0], [0], [1], [0, 0, 1, 1], [], []>} : vector<2x32xf32>, vector<32x128xf32>, vector<2x128xf32> -> vector<2x128xf32>
    %56 = arith.addf %54, %55 : vector<2x128xf32>
    %57 = arith.mulf %56, %33 : vector<2x128xf32>
    %58 = math.tanh %57 : vector<2x128xf32>
    %cst_15 = arith.constant 1.000000e+00 : f32
    %59 = vector.broadcast %cst_15 : f32 to vector<2x128xf32>
    %60 = arith.addf %58, %59 : vector<2x128xf32>
    %cst_16 = arith.constant 5.000000e-01 : f32
    %61 = vector.broadcast %cst_16 : f32 to vector<2x128xf32>
    %62 = arith.mulf %61, %60 : vector<2x128xf32>
    %63 = vector.extract_strided_slice %62 {offsets = [0, 0], sizes = [2, 32], strides = [1, 1]} : vector<2x128xf32> to vector<2x32xf32>
    %64 = vector.extract_strided_slice %62 {offsets = [0, 32], sizes = [2, 32], strides = [1, 1]} : vector<2x128xf32> to vector<2x32xf32>
    %65 = vector.extract_strided_slice %58 {offsets = [0, 64], sizes = [2, 32], strides = [1, 1]} : vector<2x128xf32> to vector<2x32xf32>
    %66 = vector.extract_strided_slice %62 {offsets = [0, 96], sizes = [2, 32], strides = [1, 1]} : vector<2x128xf32> to vector<2x32xf32>
    %67 = arith.mulf %64, %51 : vector<2x32xf32>
    %68 = arith.mulf %63, %65 : vector<2x32xf32>
    %69 = arith.addf %67, %68 : vector<2x32xf32>
    %70 = math.tanh %69 : vector<2x32xf32>
    %71 = arith.mulf %66, %70 : vector<2x32xf32>
    %72 = vector.extract_strided_slice %23 {offsets = [4, 0], sizes = [2, 128], strides = [1, 1]} : vector<16x128xf32> to vector<2x128xf32>
    %cst_17 = arith.constant dense<0.000000e+00> : vector<2x128xf32>
    %73 = tpu.matmul %71, %24, %cst_17 {dimension_numbers = #tpu.dot_dimension_numbers<[1], [0], [0], [1], [0, 0, 1, 1], [], []>} : vector<2x32xf32>, vector<32x128xf32>, vector<2x128xf32> -> vector<2x128xf32>
    %74 = arith.addf %72, %73 : vector<2x128xf32>
    %75 = arith.mulf %74, %33 : vector<2x128xf32>
    %76 = math.tanh %75 : vector<2x128xf32>
    %cst_18 = arith.constant 1.000000e+00 : f32
    %77 = vector.broadcast %cst_18 : f32 to vector<2x128xf32>
    %78 = arith.addf %76, %77 : vector<2x128xf32>
    %cst_19 = arith.constant 5.000000e-01 : f32
    %79 = vector.broadcast %cst_19 : f32 to vector<2x128xf32>
    %80 = arith.mulf %79, %78 : vector<2x128xf32>
    %81 = vector.extract_strided_slice %80 {offsets = [0, 0], sizes = [2, 32], strides = [1, 1]} : vector<2x128xf32> to vector<2x32xf32>
    %82 = vector.extract_strided_slice %80 {offsets = [0, 32], sizes = [2, 32], strides = [1, 1]} : vector<2x128xf32> to vector<2x32xf32>
    %83 = vector.extract_strided_slice %76 {offsets = [0, 64], sizes = [2, 32], strides = [1, 1]} : vector<2x128xf32> to vector<2x32xf32>
    %84 = vector.extract_strided_slice %80 {offsets = [0, 96], sizes = [2, 32], strides = [1, 1]} : vector<2x128xf32> to vector<2x32xf32>
    %85 = arith.mulf %82, %69 : vector<2x32xf32>
    %86 = arith.mulf %81, %83 : vector<2x32xf32>
    %87 = arith.addf %85, %86 : vector<2x32xf32>
    %88 = math.tanh %87 : vector<2x32xf32>
    %89 = arith.mulf %84, %88 : vector<2x32xf32>
    %90 = vector.extract_strided_slice %23 {offsets = [6, 0], sizes = [2, 128], strides = [1, 1]} : vector<16x128xf32> to vector<2x128xf32>
    %cst_20 = arith.constant dense<0.000000e+00> : vector<2x128xf32>
    %91 = tpu.matmul %89, %24, %cst_20 {dimension_numbers = #tpu.dot_dimension_numbers<[1], [0], [0], [1], [0, 0, 1, 1], [], []>} : vector<2x32xf32>, vector<32x128xf32>, vector<2x128xf32> -> vector<2x128xf32>
    %92 = arith.addf %90, %91 : vector<2x128xf32>
    %93 = arith.mulf %92, %33 : vector<2x128xf32>
    %94 = math.tanh %93 : vector<2x128xf32>
    %cst_21 = arith.constant 1.000000e+00 : f32
    %95 = vector.broadcast %cst_21 : f32 to vector<2x128xf32>
    %96 = arith.addf %94, %95 : vector<2x128xf32>
    %cst_22 = arith.constant 5.000000e-01 : f32
    %97 = vector.broadcast %cst_22 : f32 to vector<2x128xf32>
    %98 = arith.mulf %97, %96 : vector<2x128xf32>
    %99 = vector.extract_strided_slice %98 {offsets = [0, 0], sizes = [2, 32], strides = [1, 1]} : vector<2x128xf32> to vector<2x32xf32>
    %100 = vector.extract_strided_slice %98 {offsets = [0, 32], sizes = [2, 32], strides = [1, 1]} : vector<2x128xf32> to vector<2x32xf32>
    %101 = vector.extract_strided_slice %94 {offsets = [0, 64], sizes = [2, 32], strides = [1, 1]} : vector<2x128xf32> to vector<2x32xf32>
    %102 = vector.extract_strided_slice %98 {offsets = [0, 96], sizes = [2, 32], strides = [1, 1]} : vector<2x128xf32> to vector<2x32xf32>
    %103 = arith.mulf %100, %87 : vector<2x32xf32>
    %104 = arith.mulf %99, %101 : vector<2x32xf32>
    %105 = arith.addf %103, %104 : vector<2x32xf32>
    %106 = math.tanh %105 : vector<2x32xf32>
    %107 = arith.mulf %102, %106 : vector<2x32xf32>
    %108 = vector.extract_strided_slice %23 {offsets = [8, 0], sizes = [2, 128], strides = [1, 1]} : vector<16x128xf32> to vector<2x128xf32>
    %cst_23 = arith.constant dense<0.000000e+00> : vector<2x128xf32>
    %109 = tpu.matmul %107, %24, %cst_23 {dimension_numbers = #tpu.dot_dimension_numbers<[1], [0], [0], [1], [0, 0, 1, 1], [], []>} : vector<2x32xf32>, vector<32x128xf32>, vector<2x128xf32> -> vector<2x128xf32>
    %110 = arith.addf %108, %109 : vector<2x128xf32>
    %111 = arith.mulf %110, %33 : vector<2x128xf32>
    %112 = math.tanh %111 : vector<2x128xf32>
    %cst_24 = arith.constant 1.000000e+00 : f32
    %113 = vector.broadcast %cst_24 : f32 to vector<2x128xf32>
    %114 = arith.addf %112, %113 : vector<2x128xf32>
    %cst_25 = arith.constant 5.000000e-01 : f32
    %115 = vector.broadcast %cst_25 : f32 to vector<2x128xf32>
    %116 = arith.mulf %115, %114 : vector<2x128xf32>
    %117 = vector.extract_strided_slice %116 {offsets = [0, 0], sizes = [2, 32], strides = [1, 1]} : vector<2x128xf32> to vector<2x32xf32>
    %118 = vector.extract_strided_slice %116 {offsets = [0, 32], sizes = [2, 32], strides = [1, 1]} : vector<2x128xf32> to vector<2x32xf32>
    %119 = vector.extract_strided_slice %112 {offsets = [0, 64], sizes = [2, 32], strides = [1, 1]} : vector<2x128xf32> to vector<2x32xf32>
    %120 = vector.extract_strided_slice %116 {offsets = [0, 96], sizes = [2, 32], strides = [1, 1]} : vector<2x128xf32> to vector<2x32xf32>
    %121 = arith.mulf %118, %105 : vector<2x32xf32>
    %122 = arith.mulf %117, %119 : vector<2x32xf32>
    %123 = arith.addf %121, %122 : vector<2x32xf32>
    %124 = math.tanh %123 : vector<2x32xf32>
    %125 = arith.mulf %120, %124 : vector<2x32xf32>
    %126 = vector.extract_strided_slice %23 {offsets = [10, 0], sizes = [2, 128], strides = [1, 1]} : vector<16x128xf32> to vector<2x128xf32>
    %cst_26 = arith.constant dense<0.000000e+00> : vector<2x128xf32>
    %127 = tpu.matmul %125, %24, %cst_26 {dimension_numbers = #tpu.dot_dimension_numbers<[1], [0], [0], [1], [0, 0, 1, 1], [], []>} : vector<2x32xf32>, vector<32x128xf32>, vector<2x128xf32> -> vector<2x128xf32>
    %128 = arith.addf %126, %127 : vector<2x128xf32>
    %129 = arith.mulf %128, %33 : vector<2x128xf32>
    %130 = math.tanh %129 : vector<2x128xf32>
    %cst_27 = arith.constant 1.000000e+00 : f32
    %131 = vector.broadcast %cst_27 : f32 to vector<2x128xf32>
    %132 = arith.addf %130, %131 : vector<2x128xf32>
    %cst_28 = arith.constant 5.000000e-01 : f32
    %133 = vector.broadcast %cst_28 : f32 to vector<2x128xf32>
    %134 = arith.mulf %133, %132 : vector<2x128xf32>
    %135 = vector.extract_strided_slice %134 {offsets = [0, 0], sizes = [2, 32], strides = [1, 1]} : vector<2x128xf32> to vector<2x32xf32>
    %136 = vector.extract_strided_slice %134 {offsets = [0, 32], sizes = [2, 32], strides = [1, 1]} : vector<2x128xf32> to vector<2x32xf32>
    %137 = vector.extract_strided_slice %130 {offsets = [0, 64], sizes = [2, 32], strides = [1, 1]} : vector<2x128xf32> to vector<2x32xf32>
    %138 = vector.extract_strided_slice %134 {offsets = [0, 96], sizes = [2, 32], strides = [1, 1]} : vector<2x128xf32> to vector<2x32xf32>
    %139 = arith.mulf %136, %123 : vector<2x32xf32>
    %140 = arith.mulf %135, %137 : vector<2x32xf32>
    %141 = arith.addf %139, %140 : vector<2x32xf32>
    %142 = math.tanh %141 : vector<2x32xf32>
    %143 = arith.mulf %138, %142 : vector<2x32xf32>
    %144 = vector.extract_strided_slice %23 {offsets = [12, 0], sizes = [2, 128], strides = [1, 1]} : vector<16x128xf32> to vector<2x128xf32>
    %cst_29 = arith.constant dense<0.000000e+00> : vector<2x128xf32>
    %145 = tpu.matmul %143, %24, %cst_29 {dimension_numbers = #tpu.dot_dimension_numbers<[1], [0], [0], [1], [0, 0, 1, 1], [], []>} : vector<2x32xf32>, vector<32x128xf32>, vector<2x128xf32> -> vector<2x128xf32>
    %146 = arith.addf %144, %145 : vector<2x128xf32>
    %147 = arith.mulf %146, %33 : vector<2x128xf32>
    %148 = math.tanh %147 : vector<2x128xf32>
    %cst_30 = arith.constant 1.000000e+00 : f32
    %149 = vector.broadcast %cst_30 : f32 to vector<2x128xf32>
    %150 = arith.addf %148, %149 : vector<2x128xf32>
    %cst_31 = arith.constant 5.000000e-01 : f32
    %151 = vector.broadcast %cst_31 : f32 to vector<2x128xf32>
    %152 = arith.mulf %151, %150 : vector<2x128xf32>
    %153 = vector.extract_strided_slice %152 {offsets = [0, 0], sizes = [2, 32], strides = [1, 1]} : vector<2x128xf32> to vector<2x32xf32>
    %154 = vector.extract_strided_slice %152 {offsets = [0, 32], sizes = [2, 32], strides = [1, 1]} : vector<2x128xf32> to vector<2x32xf32>
    %155 = vector.extract_strided_slice %148 {offsets = [0, 64], sizes = [2, 32], strides = [1, 1]} : vector<2x128xf32> to vector<2x32xf32>
    %156 = vector.extract_strided_slice %152 {offsets = [0, 96], sizes = [2, 32], strides = [1, 1]} : vector<2x128xf32> to vector<2x32xf32>
    %157 = arith.mulf %154, %141 : vector<2x32xf32>
    %158 = arith.mulf %153, %155 : vector<2x32xf32>
    %159 = arith.addf %157, %158 : vector<2x32xf32>
    %160 = math.tanh %159 : vector<2x32xf32>
    %161 = arith.mulf %156, %160 : vector<2x32xf32>
    %162 = vector.extract_strided_slice %23 {offsets = [14, 0], sizes = [2, 128], strides = [1, 1]} : vector<16x128xf32> to vector<2x128xf32>
    %cst_32 = arith.constant dense<0.000000e+00> : vector<2x128xf32>
    %163 = tpu.matmul %161, %24, %cst_32 {dimension_numbers = #tpu.dot_dimension_numbers<[1], [0], [0], [1], [0, 0, 1, 1], [], []>} : vector<2x32xf32>, vector<32x128xf32>, vector<2x128xf32> -> vector<2x128xf32>
    %164 = arith.addf %162, %163 : vector<2x128xf32>
    %165 = arith.mulf %164, %33 : vector<2x128xf32>
    %166 = math.tanh %165 : vector<2x128xf32>
    %cst_33 = arith.constant 1.000000e+00 : f32
    %167 = vector.broadcast %cst_33 : f32 to vector<2x128xf32>
    %168 = arith.addf %166, %167 : vector<2x128xf32>
    %cst_34 = arith.constant 5.000000e-01 : f32
    %169 = vector.broadcast %cst_34 : f32 to vector<2x128xf32>
    %170 = arith.mulf %169, %168 : vector<2x128xf32>
    %171 = vector.extract_strided_slice %170 {offsets = [0, 0], sizes = [2, 32], strides = [1, 1]} : vector<2x128xf32> to vector<2x32xf32>
    %172 = vector.extract_strided_slice %170 {offsets = [0, 32], sizes = [2, 32], strides = [1, 1]} : vector<2x128xf32> to vector<2x32xf32>
    %173 = vector.extract_strided_slice %166 {offsets = [0, 64], sizes = [2, 32], strides = [1, 1]} : vector<2x128xf32> to vector<2x32xf32>
    %174 = vector.extract_strided_slice %170 {offsets = [0, 96], sizes = [2, 32], strides = [1, 1]} : vector<2x128xf32> to vector<2x32xf32>
    %175 = arith.mulf %172, %159 : vector<2x32xf32>
    %176 = arith.mulf %171, %173 : vector<2x32xf32>
    %177 = arith.addf %175, %176 : vector<2x32xf32>
    %178 = math.tanh %177 : vector<2x32xf32>
    %179 = arith.mulf %174, %178 : vector<2x32xf32>
    %180 = tpu.concatenate %53, %71, %89, %107, %125, %143, %161, %179 in 0 : vector<2x32xf32>, vector<2x32xf32>, vector<2x32xf32>, vector<2x32xf32>, vector<2x32xf32>, vector<2x32xf32>, vector<2x32xf32>, vector<2x32xf32> -> vector<16x32xf32>
    %c0_35 = arith.constant 0 : index
    %c0_36 = arith.constant 0 : index
    %181 = vector.load %arg4[%c0_35, %c0_36] : memref<32x128xf32, #tpu.memory_space<vmem>>, vector<32x128xf32>
    %cst_37 = arith.constant dense<0.000000e+00> : vector<16x128xf32>
    %182 = tpu.matmul %180, %181, %cst_37 {dimension_numbers = #tpu.dot_dimension_numbers<[1], [0], [0], [1], [0, 0, 1, 1], [], []>} : vector<16x32xf32>, vector<32x128xf32>, vector<16x128xf32> -> vector<16x128xf32>
    %c0_38 = arith.constant 0 : index
    %c0_39 = arith.constant 0 : index
    %183 = vector.load %arg5[%c0_38, %c0_39] : memref<1x128xf32, #tpu.memory_space<vmem>>, vector<1x128xf32>
    %184 = vector.broadcast %183 : vector<1x128xf32> to vector<16x128xf32>
    %185 = arith.addf %182, %184 : vector<16x128xf32>
    %c0_40 = arith.constant 0 : index
    %c0_41 = arith.constant 0 : index
    %186 = vector.load %arg6[%c0_40, %c0_41] : memref<16x128xf32, #tpu.memory_space<vmem>>, vector<16x128xf32>
    tpu.vector_store %arg6[%c0_40, %c0_41], %185 {strides = array<i32>} : memref<16x128xf32, #tpu.memory_space<vmem>>, vector<16x128xf32>,
    return
  }
}

</mosaic_0001>

<bundles_post_ra>
// kernel: lstm_sequence_model_forward.1
= control target key start
LH: loop header
LB: loop body
LE: loop exit
PB: predicated region body
PF: predicated region fallthrough
CT: control target
= control target key end

     0   :  { %11 = vsyncpa [#allocation3], 0  ;;  %s961_s0 = inlined_call_operand.vmem [shape: s32[16,3], index: 0, kind: input, shape index: {}]   ;;  %s962_s1 = inlined_call_operand.hbm [shape: f32[128,128], index: 1, kind: input, shape index: {}]   ;;  %s963_s2 = inlined_call_operand.vmem [shape: f32[1,128], index: 2, kind: input, shape index: {}]   ;;  %s964_s3 = inlined_call_operand.vmem [shape: f32[32,128], index: 3, kind: input, shape index: {}]   ;;  %s965_s4 = inlined_call_operand.hbm [shape: f32[32,128], index: 4, kind: input, shape index: {}]   ;;  %s966_s5 = inlined_call_operand.vmem [shape: f32[1,128], index: 5, kind: input, shape index: {}]   ;;  %s967_s6 = inlined_call_operand.vmem [shape: f32[16,128], index: 6, kind: output, shape index: {}]  }
   0x1   :  { %s19_s23 = sshll.u32 %s962_s1, 4  ;;  %s20_s23 = int_to_ptr.hbm [resolvable:$true] %s19_s23 }
   0x2   :  { %12 = vsyncpa [#allocation5], 0  ;;  %s745_s24 = smov [#allocation2]   ;;  %s36_s28 = sshll.u32 %s965_s4, 4  ;;  %s37_s28 = int_to_ptr.hbm [resolvable:$true] %s36_s28 }
   0x3   :  { %s21_s25 = sshll.u32 %s745_s24, 4  ;;  %s746_s29 = smov 128   ;;  %s22_s25 = int_to_ptr.vmem [resolvable:$true] %s21_s25 }
   0x4   :  { %s747_s30 = smov 8   ;;  %s748_s7 = smov [#allocation4]  }
   0x5   :  { %27 = dma.hbm_to_vmem [thread:$0]  %s20_s23, 2048, %s22_s25, [#allocation3], %s746_s29, %s746_s29, %s747_s30  }
   0x6   :  { %s38_s8 = sshll.u32 %s748_s7, 4  ;;  %s39_s8 = int_to_ptr.vmem [resolvable:$true] %s38_s8 }
   0x7   :  { %44 = dma.hbm_to_vmem [thread:$0]  %s37_s28, 512, %s39_s8, [#allocation5], %s746_s29, %s746_s29, %s747_s30  }
   0x8   :  { %741 = dma.done.wait [#allocation3], 2048  }
   0x9   :  { %742 = vsyncadd [#allocation3], 4294965248 }
   0xa   :  { %743 = dma.done.wait [#allocation5], 512  }
   0xb   :  { %744 = vsyncadd [#allocation5], 4294966784  ;;  %v749_v0 = vmov 0   ;;  %v750_v1 = vmov 2   ;;  %v751_v2 = vmov 1   ;;  %v55_v3 = vld [vmem:[%s961_s0] sm:$0xff]  ;;  %v57_v25 = vlaneseq }
   0xc   :  { %653 = vset.pattern.permute.xlu0 %v749_v0  ;;  %655 = vset.pattern.permute.xlu1 %v750_v1  ;;  %v114_v4 = vld [vmem:[#allocation2 + $0x78] sm:$0xff]  ;;  %v113_v5 = vld [vmem:[#allocation2 + $0x70] sm:$0xff]  ;;  %v112_v6 = vld [vmem:[#allocation2 + $0x68] sm:$0xff]  ;;  %v752_v24 = vmov 0.0   ;;  %v753_v39 = vmov 0.5   ;;  %s754_s18 = smov 64  }
   0xd   :  { %657 = vset.pattern.permute.xlu2 %v751_v2  ;;  %60 = vperm.xlu0 %653, %v55_v3   ;;  %v111_v7 = vld [vmem:[#allocation2 + $0x60] sm:$0xff]  ;;  %v110_v8 = vld [vmem:[#allocation2 + $0x58] sm:$0xff]  ;;  %v109_v9 = vld [vmem:[#allocation2 + $0x50] sm:$0xff]  ;;  %v849_v27 = vand.u32 127, %v57_v25  ;;  %vm150_vm6 = vcmask 261120   ;;  %vm569_vm7 = vcmask 1041408  }
   0xe   :  { %86 = vperm.xlu1 %655, %v55_v3   ;;  %119 = vmatpush.msra.mxu0 %v114_v4  ;;  %v108_v10 = vld [vmem:[#allocation2 + $0x48] sm:$0xff]  ;;  %v107_v11 = vld [vmem:[#allocation2 + $0x40] sm:$0xff]  ;;  %v106_v12 = vld [vmem:[#allocation2 + $0x38] sm:$0xff]  ;;  %vm571_vm8 = vcmask 1043456   ;;  %vm573_vm9 = vcmask 1045504  }
   0xf   :  { %v105_v13 = vld [vmem:[#allocation2 + $0x30] sm:$0xff]  ;;  %v104_v14 = vld [vmem:[#allocation2 + $0x28] sm:$0xff]  ;;  %v103_v15 = vld [vmem:[#allocation2 + $0x20] sm:$0xff]  ;;  %vm146_vm3 = vcmp.ge.s32.totalorder %v849_v27, 64  ;;  %vm147_vm4 = vcmp.lt.s32.totalorder %v849_v27, 96 }
  0x10   :  { %120 = vmatpush.msra.mxu0 %v113_v5  ;;  %v102_v16 = vld [vmem:[#allocation2 + $0x18] sm:$0xff]  ;;  %v101_v17 = vld [vmem:[#allocation2 + $0x10] sm:$0xff]  ;;  %v100_v19 = vld [vmem:[#allocation2 + $0x8] sm:$0xff] }
  0x11   :  { %v803_v18 = vld [vmem:[%s964_s3 + $0x18] sm:$0xff]  ;;  %v809_v20 = vld [vmem:[%s964_s3 + $0x10] sm:$0xff]  ;;  %v99_v21 = vld [vmem:[#allocation2] sm:$0xff] }
  0x12   :  { %121 = vmatpush.msra.mxu0 %v112_v6  ;;  %166 = vmatpush.msra.mxu1 %v803_v18  ;;  %v817_v22 = vld [vmem:[%s964_s3 + $0x8] sm:$0xff]  ;;  %v825_v23 = vld [vmem:[%s964_s3] sm:$0xff]  ;;  %vm148_vm5 = vmand %vm146_vm3, %vm147_vm4 }
  0x13   :  { %213 = vmatpush.msra.mxu2 %v803_v18  ;;  %267 = vmatpush.msra.mxu3 %v803_v18  ;;  %v862_v35 = vld [vmem:[%s963_s2] ss:$0 sm:$0xff]  ;;  %v867_v40 = vsel %vm148_vm5, 1.0, %v753_v39  ;;  %s755_s2 = smov 32  }
  0x14   :  { %122 = vmatpush.msra.mxu0 %v111_v7  ;;  %167 = vmatpush.msra.mxu1 %v809_v20 }
  0x15   :  { %654 = vset.pattern.permute.xlu0 %v751_v2  ;;  %214 = vmatpush.msra.mxu2 %v809_v20 }
  0x16   :  { %656 = vset.pattern.permute.xlu1 %v749_v0  ;;  %72 = vperm.xlu0 %654, %v55_v3  }
  0x17   :  { %123 = vmatpush.msra.mxu0 %v110_v8  ;;  %268 = vmatpush.msra.mxu3 %v809_v20 }
  0x18   :  { %168 = vmatpush.msra.mxu1 %v817_v22  ;;  %215 = vmatpush.msra.mxu2 %v817_v22 }
  0x19   :  { %124 = vmatpush.msra.mxu0 %v109_v9  ;;  %269 = vmatpush.msra.mxu3 %v817_v22 }
  0x1a   :  { %169 = vmatpush.msra.mxu1 %v825_v23  ;;  %216 = vmatpush.msra.mxu2 %v825_v23 }
  0x1b   :  { %125 = vmatpush.msra.mxu0 %v108_v10  ;;  %170 = vmatmul.f32.vlgmr.msra.gmra.mxu1 %v752_v24 }
  0x1c   :  { %270 = vmatpush.msra.mxu3 %v825_v23  ;;  %321 = vmatpush.msrb.mxu1 %v803_v18 }
  0x1d   :  { %126 = vmatpush.msra.mxu0 %v107_v11  ;;  %375 = vmatpush.msrb.mxu2 %v803_v18 }
  0x1e   :  { %658 = vset.pattern.permute.xlu0 %v750_v1  ;;  %425 = vmatpush.msrb.mxu3 %v803_v18 }
  0x1f   :  { %127 = vmatpush.msra.mxu0 %v106_v12  ;;  %322 = vmatpush.msrb.mxu1 %v809_v20 }
  0x20   :  { %376 = vmatpush.msrb.mxu2 %v809_v20  ;;  %426 = vmatpush.msrb.mxu3 %v809_v20 }
  0x21   :  { %128 = vmatpush.msra.mxu0 %v105_v13  ;;  %323 = vmatpush.msrb.mxu1 %v817_v22 }
  0x22   :  { %377 = vmatpush.msrb.mxu2 %v817_v22  ;;  %427 = vmatpush.msrb.mxu3 %v817_v22 }
  0x23   :  { %129 = vmatpush.msra.mxu0 %v104_v14  ;;  %324 = vmatpush.msrb.mxu1 %v825_v23 }
  0x24   :  { %378 = vmatpush.msrb.mxu2 %v825_v23  ;;  %428 = vmatpush.msrb.mxu3 %v825_v23 }
  0x25   :  { %130 = vmatpush.msra.mxu0 %v103_v15  ;;  %479 = vmatpush.msra.mxu1 %v803_v18 }
  0x27   :  { %131 = vmatpush.msra.mxu0 %v102_v16  ;;  %480 = vmatpush.msra.mxu1 %v809_v20 }
  0x29   :  { %132 = vmatpush.msra.mxu0 %v101_v17  ;;  %481 = vmatpush.msra.mxu1 %v817_v22 }
  0x2b   :  { %133 = vmatpush.msra.mxu0 %v100_v19  ;;  %482 = vmatpush.msra.mxu1 %v825_v23 }
  0x2d   :  { %134 = vmatpush.msra.mxu0 %v99_v21 }
  0x7f   :  { %v61_v26 = vpop.permute.xlu0 %60 }
  0x80   :  { %v87_v28 = vpop.permute.xlu1 %86  ;;  %vm65_vm0 = vcmp.eq.s32.totalorder %v849_v27, %v61_v26 }
  0x81   :  { %vm91_vm1 = vcmp.eq.s32.totalorder %v849_v27, %v87_v28  ;;  %v627_v30 = vsel %vm65_vm0, 1.0, %v752_v24 }
  0x82   :  { %v631_v32 = vsel %vm91_vm1, 1.0, %v752_v24 }
  0x88   :  { %v73_v29 = vpop.permute.xlu0 %72 }
  0x89   :  { %vm77_vm2 = vcmp.eq.s32.totalorder %v849_v27, %v73_v29 }
  0x8a   :  { %v629_v31 = vsel %vm77_vm2, 1.0, %v752_v24 }
  0x8b   :  { %v83_v33 = vadd.f32 %v629_v31, %v627_v30 }
  0x8d   :  { %v97_v34 = vadd.f32 %v631_v32, %v83_v33 }
  0x8f   :  { %135 = vmatmul.f32.vlgmr.msra.gmra.mxu0 %v97_v34 }
  0x98   :  { %v171_v37 = vpop.f32.mrf.mxu1 }
 0x10c   :  { %v136_v36 = vpop.f32.mrf.mxu0 }
 0x10d   :  { %v865_v38 = vadd.f32 %v862_v35, %v136_v36 }
 0x10f   :  { %v174_v41 = vadd.f32 %v171_v37, %v865_v38 }
 0x111   :  { %v175_v42 = vmul.f32 %v174_v41, %v867_v40 }
 0x113   :  { %661 = vtanh.f32 %v175_v42 }
 0x119   :  { %v662_v43 = vpop.eup %661 }
 0x11a   :  { %181 = vrot.lane.b32.xlu1 %v662_v43, %s754_s18  ;;  %v177_v44 = vadd.f32 1.0, %v662_v43  ;;  %v56_v43 = vld [vmem:[%s961_s0 + $0x8] sm:$0xff] }
 0x11c   :  { %v178_v45 = vmul.f32 0.5, %v177_v44 }
 0x11e   :  { %v179_v48 = vmul.f32 0.0, %v178_v45 }
 0x18c   :  { %v182_v46 = vpop.permute.xlu1 %181 }
 0x18d   :  { %v184_v47 = vmul.f32 %v182_v46, %v178_v45 }
 0x18f   :  { %186 = vrot.lane.b32.xlu2 %v184_v47, %s755_s2 }
 0x1e9   :  { %v187_v49 = vpop.permute.xlu2 %186 }
 0x1ea   :  { %v189_v50 = vadd.f32 %v187_v49, %v179_v48 }
 0x1ec   :  { %663 = vtanh.f32 %v189_v50  ;;  %v230_v0 = vrot.slane %v189_v50, 6 }
 0x1f2   :  { %v664_v51 = vpop.eup %663 }
 0x1f3   :  { %192 = vrot.lane.b32.xlu2 %v664_v51, %s754_s18 }
 0x24d   :  { %v193_v52 = vpop.permute.xlu2 %192 }
 0x24e   :  { %v195_v53 = vmul.f32 %v193_v52, %v178_v45 }
 0x250   :  { %197 = vrot.lane.b32.xlu1 %v195_v53, %s755_s2 }
 0x2c2   :  { %v198_v54 = vpop.permute.xlu1 %197 }
 0x2c3   :  { %633 = vmatmul.msk.f32.vlgmr.msra.gmra.mxu2 %vm150_vm6, %v198_v54 }
 0x2c4   :  { %533 = vmatpush.msra.mxu2 %v803_v18 }
 0x2c6   :  { %534 = vmatpush.msra.mxu2 %v809_v20 }
 0x2c8   :  { %535 = vmatpush.msra.mxu2 %v817_v22 }
 0x2ca   :  { %536 = vmatpush.msra.mxu2 %v825_v23 }
 0x346   :  { %v218_v55 = vpop.f32.mrf.mxu2 }
 0x347   :  { %v222_v56 = vrot.slane %v218_v55, 6 }
 0x349   :  { %v224_v57 = vadd.f32 %v222_v56, %v865_v38 }
 0x34b   :  { %v225_v58 = vmul.f32 %v224_v57, %v867_v40 }
 0x34d   :  { %665 = vtanh.f32 %v225_v58 }
 0x353   :  { %v666_v59 = vpop.eup %665 }
 0x354   :  { %234 = vrot.lane.b32.xlu2 %v666_v59, %s754_s18  ;;  %v227_v60 = vadd.f32 1.0, %v666_v59 }
 0x356   :  { %v228_v61 = vmul.f32 0.5, %v227_v60 }
 0x358   :  { %v232_v1 = vmul.f32 %v230_v0, %v228_v61 }
 0x3ae   :  { %v235_v62 = vpop.permute.xlu2 %234 }
 0x3af   :  { %v237_v63 = vmul.f32 %v235_v62, %v228_v61 }
 0x3b1   :  { %239 = vrot.lane.b32.xlu0 %v237_v63, %s755_s2 }
 0x423   :  { %v240_v2 = vpop.permute.xlu0 %239 }
 0x424   :  { %v242_v3 = vadd.f32 %v240_v2, %v232_v1 }
 0x426   :  { %667 = vtanh.f32 %v242_v3  ;;  %v284_v18 = vrot.slane %v242_v3, 6 }
 0x42c   :  { %v668_v4 = vpop.eup %667 }
 0x42d   :  { %245 = vrot.lane.b32.xlu1 %v668_v4, %s754_s18 }
 0x49f   :  { %v246_v5 = vpop.permute.xlu1 %245 }
 0x4a0   :  { %v248_v6 = vmul.f32 %v246_v5, %v228_v61 }
 0x4a2   :  { %v250_v7 = vrot.slane %v248_v6, 2  ;;  %v570_v26 = vsel %vm569_vm7, %v195_v53, %v248_v6 }
 0x4a4   :  { %251 = vrot.lane.b32.xlu2 %v250_v7, %s755_s2 }
 0x4fe   :  { %v252_v8 = vpop.permute.xlu2 %251 }
 0x4ff   :  { %634 = vmatmul.msk.f32.vlgmr.msra.gmra.mxu3 %vm150_vm6, %v252_v8 }
 0x582   :  { %v272_v9 = vpop.f32.mrf.mxu3 }
 0x583   :  { %v276_v10 = vrot.slane %v272_v9, 4 }
 0x585   :  { %v278_v11 = vadd.f32 %v276_v10, %v865_v38 }
 0x587   :  { %v279_v12 = vmul.f32 %v278_v11, %v867_v40 }
 0x589   :  { %669 = vtanh.f32 %v279_v12 }
 0x58f   :  { %v670_v13 = vpop.eup %669 }
 0x590   :  { %288 = vrot.lane.b32.xlu0 %v670_v13, %s754_s18  ;;  %v281_v14 = vadd.f32 1.0, %v670_v13 }
 0x592   :  { %v282_v15 = vmul.f32 0.5, %v281_v14 }
 0x594   :  { %v286_v19 = vmul.f32 %v284_v18, %v282_v15 }
 0x602   :  { %v289_v16 = vpop.permute.xlu0 %288 }
 0x603   :  { %v291_v17 = vmul.f32 %v289_v16, %v282_v15 }
 0x605   :  { %293 = vrot.lane.b32.xlu1 %v291_v17, %s755_s2 }
 0x677   :  { %v294_v20 = vpop.permute.xlu1 %293 }
 0x678   :  { %v296_v21 = vadd.f32 %v294_v20, %v286_v19 }
 0x67a   :  { %671 = vtanh.f32 %v296_v21  ;;  %v338_v44 = vrot.slane %v296_v21, 6 }
 0x680   :  { %v672_v22 = vpop.eup %671 }
 0x681   :  { %299 = vrot.lane.b32.xlu2 %v672_v22, %s754_s18 }
 0x6db   :  { %v300_v23 = vpop.permute.xlu2 %299 }
 0x6dc   :  { %v302_v25 = vmul.f32 %v300_v23, %v282_v15 }
 0x6de   :  { %v304_v28 = vrot.slane %v302_v25, 4  ;;  %v572_v29 = vsel %vm571_vm8, %v570_v26, %v302_v25 }
 0x6e0   :  { %305 = vrot.lane.b32.xlu0 %v304_v28, %s755_s2 }
 0x752   :  { %v306_v30 = vpop.permute.xlu0 %305 }
 0x753   :  { %635 = vmatmul.msk.f32.vlgmr.msrb.gmra.mxu1 %vm150_vm6, %v306_v30 }
 0x7d0   :  { %v326_v31 = vpop.f32.mrf.mxu1 }
 0x7d1   :  { %v330_v32 = vrot.slane %v326_v31, 2 }
 0x7d3   :  { %v332_v33 = vadd.f32 %v330_v32, %v865_v38 }
 0x7d5   :  { %v333_v34 = vmul.f32 %v332_v33, %v867_v40 }
 0x7d7   :  { %673 = vtanh.f32 %v333_v34 }
 0x7dd   :  { %v674_v36 = vpop.eup %673 }
 0x7de   :  { %342 = vrot.lane.b32.xlu1 %v674_v36, %s754_s18  ;;  %v335_v37 = vadd.f32 1.0, %v674_v36 }
 0x7e0   :  { %v336_v39 = vmul.f32 0.5, %v335_v37 }
 0x7e2   :  { %v340_v38 = vmul.f32 %v338_v44, %v336_v39 }
 0x7e6   :  { %63 = vperm.xlu1 %656, %v56_v43  }
 0x850   :  { %v343_v41 = vpop.permute.xlu1 %342 }
 0x851   :  { %v345_v42 = vmul.f32 %v343_v41, %v336_v39 }
 0x853   :  { %347 = vrot.lane.b32.xlu2 %v345_v42, %s755_s2 }
 0x858   :  { %v64_v48 = vpop.permute.xlu1 %63 }
 0x859   :  { %vm66_vm10 = vcmp.eq.s32.totalorder %v849_v27, %v64_v48 }
 0x85a   :  { %v628_v54 = vsel %vm66_vm10, 1.0, %v752_v24 }
 0x85b   :  { %75 = vperm.xlu2 %657, %v56_v43  }
 0x8ad   :  { %v348_v45 = vpop.permute.xlu2 %347 }
 0x8ae   :  { %v350_v46 = vadd.f32 %v348_v45, %v340_v38 }
 0x8b0   :  { %675 = vtanh.f32 %v350_v46  ;;  %v389_v5 = vrot.slane %v350_v46, 6 }
 0x8b5   :  { %v76_v49 = vpop.permute.xlu2 %75 }
 0x8b6   :  { %v676_v47 = vpop.eup %675  ;;  %vm78_vm11 = vcmp.eq.s32.totalorder %v849_v27, %v76_v49 }
 0x8b7   :  { %353 = vrot.lane.b32.xlu0 %v676_v47, %s754_s18  ;;  %v630_v55 = vsel %vm78_vm11, 1.0, %v752_v24 }
 0x8b8   :  { %v84_v56 = vadd.f32 %v630_v55, %v628_v54 }
 0x8bf   :  { %89 = vperm.xlu0 %658, %v56_v43  }
 0x929   :  { %v354_v50 = vpop.permute.xlu0 %353 }
 0x92a   :  { %v356_v51 = vmul.f32 %v354_v50, %v336_v39 }
 0x92c   :  { %v358_v52 = vrot.slane %v356_v51, 6  ;;  %v907_v53 = vsel %vm573_vm9, %v572_v29, %v356_v51 }
 0x92e   :  { %359 = vrot.lane.b32.xlu1 %v358_v52, %s755_s2 }
 0x931   :  { %v90_v57 = vpop.permute.xlu0 %89 }
 0x932   :  { %vm92_vm12 = vcmp.eq.s32.totalorder %v849_v27, %v90_v57 }
 0x933   :  { %v632_v58 = vsel %vm92_vm12, 1.0, %v752_v24 }
 0x934   :  { %v98_v59 = vadd.f32 %v632_v58, %v84_v56 }
 0x936   :  { %138 = vmatmul.f32.gmra.mxu0 %v98_v59 }
 0x9a0   :  { %v360_v60 = vpop.permute.xlu1 %359 }
 0x9a1   :  { %636 = vmatmul.msk.f32.vlgmr.msrb.gmra.mxu2 %vm150_vm6, %v360_v60  ;;  %v581_v60 = vld [vmem:[#allocation4 + $0x18] sm:$0xff] }
 0x9a2   :  { %608 = vmatpush.msra.mxu3 %v581_v60 }
 0x9b3   :  { %v139_v61 = vpop.f32.mrf.mxu0 }
 0x9b4   :  { %v916_v62 = vadd.f32 %v862_v35, %v139_v61  ;;  %v580_v61 = vld [vmem:[#allocation4 + $0x10] sm:$0xff] }
 0x9b5   :  { %609 = vmatpush.msra.mxu3 %v580_v61 }
 0xa24   :  { %v380_v63 = vpop.f32.mrf.mxu2 }
 0xa25   :  { %v383_v0 = vadd.f32 %v380_v63, %v916_v62  ;;  %v579_v63 = vld [vmem:[#allocation4 + $0x8] sm:$0xff] }
 0xa26   :  { %610 = vmatpush.msra.mxu3 %v579_v63 }
 0xa27   :  { %v384_v1 = vmul.f32 %v383_v0, %v867_v40  ;;  %v578_v0 = vld [vmem:[#allocation4] sm:$0xff] }
 0xa28   :  { %611 = vmatpush.msra.mxu3 %v578_v0 }
 0xa29   :  { %677 = vtanh.f32 %v384_v1 }
 0xa2f   :  { %v678_v2 = vpop.eup %677 }
 0xa30   :  { %393 = vrot.lane.b32.xlu2 %v678_v2, %s754_s18  ;;  %v386_v27 = vadd.f32 1.0, %v678_v2 }
 0xa32   :  { %v387_v24 = vmul.f32 0.5, %v386_v27 }
 0xa34   :  { %v391_v6 = vmul.f32 %v389_v5, %v387_v24 }
 0xa8a   :  { %v394_v3 = vpop.permute.xlu2 %393 }
 0xa8b   :  { %v396_v4 = vmul.f32 %v394_v3, %v387_v24 }
 0xa8d   :  { %398 = vrot.lane.b32.xlu1 %v396_v4, %s755_s2 }
 0xaff   :  { %v399_v7 = vpop.permute.xlu1 %398 }
 0xb00   :  { %v401_v35 = vadd.f32 %v399_v7, %v391_v6  ;;  %v660_v6 = vld [vmem:[%s966_s5] ss:$0 sm:$0xff] }
 0xb02   :  { %679 = vtanh.f32 %v401_v35  ;;  %v442_v21 = vrot.slane %v401_v35, 6 }
 0xb08   :  { %v680_v8 = vpop.eup %679 }
 0xb09   :  { %404 = vrot.lane.b32.xlu2 %v680_v8, %s754_s18 }
 0xb63   :  { %v405_v9 = vpop.permute.xlu2 %404 }
 0xb64   :  { %v407_v10 = vmul.f32 %v405_v9, %v387_v24 }
 0xb66   :  { %409 = vrot.lane.b32.xlu0 %v407_v10, %s755_s2 }
 0xbd8   :  { %v410_v11 = vpop.permute.xlu0 %409 }
 0xbd9   :  { %637 = vmatmul.msk.f32.vlgmr.msrb.gmra.mxu3 %vm150_vm6, %v410_v11 }
 0xc5c   :  { %v430_v12 = vpop.f32.mrf.mxu3 }
 0xc5d   :  { %v434_v13 = vrot.slane %v430_v12, 6 }
 0xc5f   :  { %v436_v14 = vadd.f32 %v434_v13, %v916_v62 }
 0xc61   :  { %v437_v15 = vmul.f32 %v436_v14, %v867_v40 }
 0xc63   :  { %681 = vtanh.f32 %v437_v15 }
 0xc69   :  { %v682_v16 = vpop.eup %681 }
 0xc6a   :  { %446 = vrot.lane.b32.xlu1 %v682_v16, %s754_s18  ;;  %v439_v17 = vadd.f32 1.0, %v682_v16 }
 0xc6c   :  { %v440_v18 = vmul.f32 0.5, %v439_v17 }
 0xc6e   :  { %v444_v22 = vmul.f32 %v442_v21, %v440_v18 }
 0xcdc   :  { %v447_v19 = vpop.permute.xlu1 %446 }
 0xcdd   :  { %v449_v20 = vmul.f32 %v447_v19, %v440_v18 }
 0xcdf   :  { %451 = vrot.lane.b32.xlu2 %v449_v20, %s755_s2 }
 0xd39   :  { %v452_v23 = vpop.permute.xlu2 %451 }
 0xd3a   :  { %v454_v25 = vadd.f32 %v452_v23, %v444_v22 }
 0xd3c   :  { %683 = vtanh.f32 %v454_v25  ;;  %v496_v44 = vrot.slane %v454_v25, 6 }
 0xd42   :  { %v684_v26 = vpop.eup %683 }
 0xd43   :  { %457 = vrot.lane.b32.xlu0 %v684_v26, %s754_s18 }
 0xdb5   :  { %v458_v28 = vpop.permute.xlu0 %457 }
 0xdb6   :  { %v460_v29 = vmul.f32 %v458_v28, %v440_v18 }
 0xdb8   :  { %v462_v30 = vrot.slane %v460_v29, 2  ;;  %v575_v50 = vsel %vm569_vm7, %v407_v10, %v460_v29 }
 0xdba   :  { %463 = vrot.lane.b32.xlu1 %v462_v30, %s755_s2 }
 0xe2c   :  { %v464_v31 = vpop.permute.xlu1 %463 }
 0xe2d   :  { %638 = vmatmul.msk.f32.vlgmr.msra.gmra.mxu1 %vm150_vm6, %v464_v31 }
 0xeaa   :  { %v484_v32 = vpop.f32.mrf.mxu1 }
 0xeab   :  { %v488_v33 = vrot.slane %v484_v32, 4 }
 0xead   :  { %v490_v34 = vadd.f32 %v488_v33, %v916_v62 }
 0xeaf   :  { %v491_v36 = vmul.f32 %v490_v34, %v867_v40 }
 0xeb1   :  { %685 = vtanh.f32 %v491_v36 }
 0xeb7   :  { %v686_v37 = vpop.eup %685 }
 0xeb8   :  { %500 = vrot.lane.b32.xlu2 %v686_v37, %s754_s18  ;;  %v493_v39 = vadd.f32 1.0, %v686_v37 }
 0xeba   :  { %v494_v41 = vmul.f32 0.5, %v493_v39 }
 0xebc   :  { %v498_v38 = vmul.f32 %v496_v44, %v494_v41 }
 0xf12   :  { %v501_v42 = vpop.permute.xlu2 %500 }
 0xf13   :  { %v503_v43 = vmul.f32 %v501_v42, %v494_v41 }
 0xf15   :  { %505 = vrot.lane.b32.xlu0 %v503_v43, %s755_s2 }
 0xf87   :  { %v506_v45 = vpop.permute.xlu0 %505 }
 0xf88   :  { %v508_v46 = vadd.f32 %v506_v45, %v498_v38 }
 0xf8a   :  { %687 = vtanh.f32 %v508_v46  ;;  %v550_v24 = vrot.slane %v508_v46, 6 }
 0xf90   :  { %v688_v47 = vpop.eup %687 }
 0xf91   :  { %511 = vrot.lane.b32.xlu1 %v688_v47, %s754_s18 }
0x1003   :  { %v512_v48 = vpop.permute.xlu1 %511 }
0x1004   :  { %v514_v49 = vmul.f32 %v512_v48, %v494_v41 }
0x1006   :  { %v516_v51 = vrot.slane %v514_v49, 4  ;;  %v576_v52 = vsel %vm571_vm8, %v575_v50, %v514_v49 }
0x1008   :  { %517 = vrot.lane.b32.xlu2 %v516_v51, %s755_s2 }
0x1062   :  { %v518_v54 = vpop.permute.xlu2 %517 }
0x1063   :  { %639 = vmatmul.msk.f32.vlgmr.msra.gmra.mxu2 %vm150_vm6, %v518_v54 }
0x10e6   :  { %v538_v55 = vpop.f32.mrf.mxu2 }
0x10e7   :  { %v542_v56 = vrot.slane %v538_v55, 2 }
0x10e9   :  { %v544_v57 = vadd.f32 %v542_v56, %v916_v62 }
0x10eb   :  { %v545_v58 = vmul.f32 %v544_v57, %v867_v40 }
0x10ed   :  { %689 = vtanh.f32 %v545_v58 }
0x10f3   :  { %v690_v59 = vpop.eup %689 }
0x10f4   :  { %554 = vrot.lane.b32.xlu0 %v690_v59, %s754_s18  ;;  %v547_v1 = vadd.f32 1.0, %v690_v59 }
0x10f6   :  { %v548_v2 = vmul.f32 0.5, %v547_v1 }
0x10f8   :  { %v552_v3 = vmul.f32 %v550_v24, %v548_v2 }
0x10fc   :  { %588 = vrot.lane.b32.xlu0 %v907_v53, %s755_s2 }
0x1166   :  { %v555_v62 = vpop.permute.xlu0 %554 }
0x1167   :  { %v557_v27 = vmul.f32 %v555_v62, %v548_v2 }
0x1169   :  { %559 = vrot.lane.b32.xlu1 %v557_v27, %s755_s2 }
0x116e   :  { %v589_v40 = vpop.permute.xlu0 %588 }
0x116f   :  { %640 = vmatmul.msk.f32.vlgmr.msra.gmra.mxu3 %vm150_vm6, %v589_v40 }
0x11db   :  { %v560_v53 = vpop.permute.xlu1 %559 }
0x11dc   :  { %v562_v4 = vadd.f32 %v560_v53, %v552_v3 }
0x11de   :  { %691 = vtanh.f32 %v562_v4 }
0x11e4   :  { %v692_v5 = vpop.eup %691 }
0x11e5   :  { %565 = vrot.lane.b32.xlu2 %v692_v5, %s754_s18 }
0x11f2   :  { %v613_v7 = vpop.f32.mrf.mxu3 }
0x11f3   :  { %v614_v35 = vadd.f32 %v660_v6, %v613_v7 }
0x11f5   :  { %619 = vst [vmem:[%s967_s6] sm:$0xff] %v614_v35 }
0x123f   :  { %v566_v8 = vpop.permute.xlu2 %565 }
0x1240   :  { %v568_v9 = vmul.f32 %v566_v8, %v548_v2 }
0x1242   :  { %v577_v10 = vsel %vm573_vm9, %v576_v52, %v568_v9 }
0x1243   :  { %590 = vrot.lane.b32.xlu1 %v577_v10, %s755_s2 }
0x12b5   :  { %v591_v11 = vpop.permute.xlu1 %590 }
0x12b6   :  { %641 = vmatmul.msk.f32.gmra.mxu3 %vm150_vm6, %v591_v11 }
0x1339   :  { %v616_v12 = vpop.f32.mrf.mxu3 }
0x133a   :  { %v617_v13 = vadd.f32 %v660_v6, %v616_v12 }
0x133c   :  { %620 = vst [vmem:[%s967_s6 + $0x8] sm:$0xff] %v617_v13 }
0x133d   :  { %625 = vsyncpa [#allocation3], 1 }
0x133e   :  { %626 = vsyncpa [#allocation5], 1 }

</bundles_post_ra>
